<compile_context>
chip_gen: v7x
topology: tpu7x:2x2x1
jax: 0.10.0
libtpu: 0.0.40
codegen_flags: <defaults>
</compile_context>

<pallas_src>
import math
import jax
import jax.numpy as jnp
from jax.experimental import pallas as pl
from jax.experimental.pallas import tpu as pltpu


def _conv3x3_ps_kernel(x_ref, w_ref, out_ref, xpad_ref):
    # x_ref:    (1, H, W, Cin)          NHWC input tile for one batch element
    # w_ref:    (2, 9*Cin, 2*Cout2)     im2col weight, split by pixel-shuffle row parity dh
    # out_ref:  (1, H, 2, W, 2*Cout2)   fused conv + pixel-shuffle output block
    # xpad_ref: (H+2, W+2, Cin)         VMEM halo scratch (zero-padded border)
    H = x_ref.shape[1]
    W = x_ref.shape[2]
    Cin = x_ref.shape[3]
    C2 = out_ref.shape[4]  # == 2 * Cout2

    # Zero the 1-pixel halo (borders only; interior is fully overwritten below).
    zrow = jnp.zeros((1, W + 2, Cin), dtype=xpad_ref.dtype)
    zcol = jnp.zeros((H, 1, Cin), dtype=xpad_ref.dtype)
    xpad_ref[0:1, :, :] = zrow
    xpad_ref[H + 1:H + 2, :, :] = zrow
    xpad_ref[1:H + 1, 0:1, :] = zcol
    xpad_ref[1:H + 1, W + 1:W + 2, :] = zcol
    # Interior.
    xpad_ref[1:H + 1, 1:W + 1, :] = x_ref[0]

    # im2col: build one (H*W, 9*Cin) patch matrix -> single large-K matmul per parity.
    patches = []
    for kh in range(3):
        for kw in range(3):
            patches.append(xpad_ref[kh:kh + H, kw:kw + W, :].reshape(H * W, Cin))
    p = jnp.concatenate(patches, axis=-1)  # (H*W, 9*Cin)

    # Accumulate in traced values (no VMEM scratch RMW), f32 accumulation on the MXU.
    y0 = jnp.dot(p, w_ref[0], preferred_element_type=jnp.float32)  # rows 2h+0
    y1 = jnp.dot(p, w_ref[1], preferred_element_type=jnp.float32)  # rows 2h+1

    out_ref[0, :, 0, :, :] = y0.reshape(H, W, C2).astype(out_ref.dtype)
    out_ref[0, :, 1, :, :] = y1.reshape(H, W, C2).astype(out_ref.dtype)


def upsample_shuffle_forward(x_blc, w_hwio, compute_dtype=None):
    """Reproduces Upsample_shuffle.forward.

    x_blc:  (B, L, C) with L a perfect square
    w_hwio: (3, 3, C, 2*C) conv weight in HWIO layout
            (torch weight (2C, C, 3, 3) transposed by (2, 3, 1, 0))
    compute_dtype: optional dtype for the matmul operands (e.g. jnp.bfloat16 on
            v6e/v7x); accumulation stays f32, output keeps x's dtype.
    returns (B, 4*L, C // 2)
    """
    B, L, C = x_blc.shape
    H = math.isqrt(L)
    W = H
    assert H * H == L, "L must be a perfect square"
    assert C % 2 == 0, "n_feat must be even for PixelShuffle(2)"
    Cout = w_hwio.shape[-1]
    assert Cout == 2 * C
    Cout2 = C // 2
    K = 9 * C

    # (B, L, C) -> NHWC (B, H, W, C); same elements as PyTorch's NCHW view.
    x_nhwc = x_blc.reshape(B, H, W, C)

    # Pre-permute weight output channels for the fused pixel-shuffle:
    #   conv output channel co = 4*c + 2*dh + dw  (PixelShuffle(2) convention)
    #   -> w_k[dh, (kh*3+kw)*C + cin, dw*Cout2 + c]
    w_flat = w_hwio.reshape(K, Cout2, 2, 2)        # (K, c, dh, dw)
    w_perm = jnp.transpose(w_flat, (2, 0, 3, 1))   # (dh, K, dw, c)
    w_k = w_perm.reshape(2, K, 2 * Cout2)          # (dh, K, dw*Cout2 + c)

    if compute_dtype is not None:
        x_nhwc = x_nhwc.astype(compute_dtype)
        w_k = w_k.astype(compute_dtype)

    out5 = pl.pallas_call(
        _conv3x3_ps_kernel,
        out_shape=jax.ShapeDtypeStruct((B, H, 2, W, 2 * Cout2), x_blc.dtype),
        grid_spec=pltpu.PrefetchScalarGridSpec(
            num_scalar_prefetch=0,
            grid=(B,),
            in_specs=[
                pl.BlockSpec((1, H, W, C), lambda b: (b, 0, 0, 0)),
                pl.BlockSpec((2, K, 2 * Cout2), lambda b: (0, 0, 0)),
            ],
            out_specs=pl.BlockSpec((1, H, 2, W, 2 * Cout2),
                                   lambda b: (b, 0, 0, 0, 0)),
            scratch_shapes=[pltpu.VMEM((H + 2, W + 2, C), x_nhwc.dtype)],
        ),
        compiler_params=pltpu.CompilerParams(
            dimension_semantics=("parallel",)
        ),
    )(x_nhwc, w_k)

    # out5[b, h, dh, w, dw*Cout2 + c] = PixelShuffle(conv(x))[b, c, 2h+dh, 2w+dw].
    # Row-major reshape to (B, 4L, C//2) is exactly the flatten(2).transpose(1,2)
    # layout -> no data movement here.
    return out5.reshape(B, 4 * L, Cout2)


def _reference_forward(x_blc, w_hwio):
    """Pure-JAX reference (lax conv + pixel shuffle) for correctness checking."""
    B, L, C = x_blc.shape
    H = math.isqrt(L)
    assert H * H == L
    x_nhwc = x_blc.reshape(B, H, H, C)
    y = jax.lax.conv_general_dilated(
        x_nhwc, w_hwio, window_strides=(1, 1), padding="SAME",
        dimension_numbers=("NHWC", "HWIO", "NHWC"),
    )
    Cout2 = C // 2
    y = y.reshape(B, H, H, Cout2, 2, 2)            # (B, H, W, c, dh, dw)
    y = jnp.transpose(y, (0, 1, 4, 2, 5, 3))        # (B, H, dh, W, dw, c)
    y = y.reshape(B, 2 * H, 2 * H, Cout2)
    return y.reshape(B, 4 * L, Cout2)


if __name__ == "__main__":
    # Small, module-consistent shapes: B=2, n_feat=C=8, H=W=8 -> L=64
    B, n_feat, H = 2, 8, 8
    L = H * H

    key = jax.random.PRNGKey(0)
    kx, kw = jax.random.split(key)
    x = jax.random.normal(kx, (B, L, n_feat), dtype=jnp.float32)
    # Conv2d(n_feat, 2*n_feat, 3, padding=1, bias=False) weight, stored as HWIO.
    w = jax.random.normal(kw, (3, 3, n_feat, 2 * n_feat), dtype=jnp.float32) * 0.1

    out = upsample_shuffle_forward(x, w)   # pass compute_dtype=jnp.bfloat16 on v6e/v7x
    out = jax.block_until_ready(out)

    ref = _reference_forward(x, w)
    assert out.shape == (B, 4 * L, n_feat // 2), out.shape
    assert jnp.allclose(out, ref, atol=1e-4, rtol=1e-4), "mismatch vs reference conv"

    print("KERNEL_OK")
</pallas_src>

<mosaic_0001>
module attributes {stable_mosaic.version = 11 : i64} {
  func.func @_conv3x3_ps_kernel(%arg0: i32, %arg1: memref<1x8x8x8xf32, #tpu.memory_space<vmem>>, %arg2: memref<2x72x8xf32, #tpu.memory_space<vmem>>, %arg3: memref<1x8x2x8x8xf32, #tpu.memory_space<vmem>>, %arg4: memref<10x10x8xf32, #tpu.memory_space<vmem>>) attributes {dimension_semantics = [#tpu.dimension_semantics<parallel>], iteration_bounds = array<i64: 2>, scalar_prefetch = 0 : i64, scratch_operands = 1 : i64, tpu.core_type = #tpu.core_type<tc>, window_params = [{transform_indices = @transform_0, window_bounds = array<i64: 1, 8, 8, 8>}, {pipeline_mode = #tpu.pipeline_mode<synchronous>, transform_indices = @transform_1, window_bounds = array<i64: 2, 72, 8>}, {transform_indices = @transform_2, window_bounds = array<i64: 1, 8, 2, 8, 8>}]} {
    %cst = arith.constant 0.000000e+00 : f32
    %0 = vector.broadcast %cst : f32 to vector<1x10x8xf32>
    %cst_0 = arith.constant 0.000000e+00 : f32
    %1 = vector.broadcast %cst_0 : f32 to vector<8x1x8xf32>
    %c0 = arith.constant 0 : index
    %c0_1 = arith.constant 0 : index
    %c0_2 = arith.constant 0 : index
    %2 = vector.load %arg4[%c0, %c0_1, %c0_2] : memref<10x10x8xf32, #tpu.memory_space<vmem>>, vector<1x10x8xf32>
    tpu.vector_store %arg4[%c0, %c0_1, %c0_2], %0 {strides = array<i32>} : memref<10x10x8xf32, #tpu.memory_space<vmem>>, vector<1x10x8xf32>,
    %c9 = arith.constant 9 : index
    %c0_3 = arith.constant 0 : index
    %c0_4 = arith.constant 0 : index
    %3 = vector.load %arg4[%c9, %c0_3, %c0_4] : memref<10x10x8xf32, #tpu.memory_space<vmem>>, vector<1x10x8xf32>
    tpu.vector_store %arg4[%c9, %c0_3, %c0_4], %0 {strides = array<i32>} : memref<10x10x8xf32, #tpu.memory_space<vmem>>, vector<1x10x8xf32>,
    %c1 = arith.constant 1 : index
    %c0_5 = arith.constant 0 : index
    %c0_6 = arith.constant 0 : index
    %4 = vector.load %arg4[%c1, %c0_5, %c0_6] : memref<10x10x8xf32, #tpu.memory_space<vmem>>, vector<8x1x8xf32>
    tpu.vector_store %arg4[%c1, %c0_5, %c0_6], %1 {strides = array<i32>} : memref<10x10x8xf32, #tpu.memory_space<vmem>>, vector<8x1x8xf32>,
    %c1_7 = arith.constant 1 : index
    %c9_8 = arith.constant 9 : index
    %c0_9 = arith.constant 0 : index
    %5 = vector.load %arg4[%c1_7, %c9_8, %c0_9] : memref<10x10x8xf32, #tpu.memory_space<vmem>>, vector<8x1x8xf32>
    tpu.vector_store %arg4[%c1_7, %c9_8, %c0_9], %1 {strides = array<i32>} : memref<10x10x8xf32, #tpu.memory_space<vmem>>, vector<8x1x8xf32>,
    %c0_10 = arith.constant 0 : index
    %c0_11 = arith.constant 0 : index
    %c0_12 = arith.constant 0 : index
    %c0_13 = arith.constant 0 : index
    %6 = vector.load %arg1[%c0_10, %c0_11, %c0_12, %c0_13] : memref<1x8x8x8xf32, #tpu.memory_space<vmem>>, vector<1x8x8x8xf32>
    %7 = vector.shape_cast %6 : vector<1x8x8x8xf32> to vector<8x8x8xf32>
    %c1_14 = arith.constant 1 : index
    %c1_15 = arith.constant 1 : index
    %c0_16 = arith.constant 0 : index
    %8 = vector.load %arg4[%c1_14, %c1_15, %c0_16] : memref<10x10x8xf32, #tpu.memory_space<vmem>>, vector<8x8x8xf32>
    tpu.vector_store %arg4[%c1_14, %c1_15, %c0_16], %7 {strides = array<i32>} : memref<10x10x8xf32, #tpu.memory_space<vmem>>, vector<8x8x8xf32>,
    %c0_17 = arith.constant 0 : index
    %c0_18 = arith.constant 0 : index
    %c0_19 = arith.constant 0 : index
    %9 = vector.load %arg4[%c0_17, %c0_18, %c0_19] : memref<10x10x8xf32, #tpu.memory_space<vmem>>, vector<8x8x8xf32>
    %10 = vector.shape_cast %9 : vector<8x8x8xf32> to vector<64x8xf32>
    %c0_20 = arith.constant 0 : index
    %c1_21 = arith.constant 1 : index
    %c0_22 = arith.constant 0 : index
    %11 = vector.load %arg4[%c0_20, %c1_21, %c0_22] : memref<10x10x8xf32, #tpu.memory_space<vmem>>, vector<8x8x8xf32>
    %12 = vector.shape_cast %11 : vector<8x8x8xf32> to vector<64x8xf32>
    %c0_23 = arith.constant 0 : index
    %c2 = arith.constant 2 : index
    %c0_24 = arith.constant 0 : index
    %13 = vector.load %arg4[%c0_23, %c2, %c0_24] : memref<10x10x8xf32, #tpu.memory_space<vmem>>, vector<8x8x8xf32>
    %14 = vector.shape_cast %13 : vector<8x8x8xf32> to vector<64x8xf32>
    %c1_25 = arith.constant 1 : index
    %c0_26 = arith.constant 0 : index
    %c0_27 = arith.constant 0 : index
    %15 = vector.load %arg4[%c1_25, %c0_26, %c0_27] : memref<10x10x8xf32, #tpu.memory_space<vmem>>, vector<8x8x8xf32>
    %16 = vector.shape_cast %15 : vector<8x8x8xf32> to vector<64x8xf32>
    %c1_28 = arith.constant 1 : index
    %c1_29 = arith.constant 1 : index
    %c0_30 = arith.constant 0 : index
    %17 = vector.load %arg4[%c1_28, %c1_29, %c0_30] : memref<10x10x8xf32, #tpu.memory_space<vmem>>, vector<8x8x8xf32>
    %18 = vector.shape_cast %17 : vector<8x8x8xf32> to vector<64x8xf32>
    %c1_31 = arith.constant 1 : index
    %c2_32 = arith.constant 2 : index
    %c0_33 = arith.constant 0 : index
    %19 = vector.load %arg4[%c1_31, %c2_32, %c0_33] : memref<10x10x8xf32, #tpu.memory_space<vmem>>, vector<8x8x8xf32>
    %20 = vector.shape_cast %19 : vector<8x8x8xf32> to vector<64x8xf32>
    %c2_34 = arith.constant 2 : index
    %c0_35 = arith.constant 0 : index
    %c0_36 = arith.constant 0 : index
    %21 = vector.load %arg4[%c2_34, %c0_35, %c0_36] : memref<10x10x8xf32, #tpu.memory_space<vmem>>, vector<8x8x8xf32>
    %22 = vector.shape_cast %21 : vector<8x8x8xf32> to vector<64x8xf32>
    %c2_37 = arith.constant 2 : index
    %c1_38 = arith.constant 1 : index
    %c0_39 = arith.constant 0 : index
    %23 = vector.load %arg4[%c2_37, %c1_38, %c0_39] : memref<10x10x8xf32, #tpu.memory_space<vmem>>, vector<8x8x8xf32>
    %24 = vector.shape_cast %23 : vector<8x8x8xf32> to vector<64x8xf32>
    %c2_40 = arith.constant 2 : index
    %c2_41 = arith.constant 2 : index
    %c0_42 = arith.constant 0 : index
    %25 = vector.load %arg4[%c2_40, %c2_41, %c0_42] : memref<10x10x8xf32, #tpu.memory_space<vmem>>, vector<8x8x8xf32>
    %26 = vector.shape_cast %25 : vector<8x8x8xf32> to vector<64x8xf32>
    %27 = tpu.concatenate %10, %12, %14, %16, %18, %20, %22, %24, %26 in 1 : vector<64x8xf32>, vector<64x8xf32>, vector<64x8xf32>, vector<64x8xf32>, vector<64x8xf32>, vector<64x8xf32>, vector<64x8xf32>, vector<64x8xf32>, vector<64x8xf32> -> vector<64x72xf32>
    %c0_43 = arith.constant 0 : index
    %c0_44 = arith.constant 0 : index
    %c0_45 = arith.constant 0 : index
    %28 = vector.load %arg2[%c0_43, %c0_44, %c0_45] : memref<2x72x8xf32, #tpu.memory_space<vmem>>, vector<1x72x8xf32>
    %29 = vector.shape_cast %28 : vector<1x72x8xf32> to vector<72x8xf32>
    %cst_46 = arith.constant dense<0.000000e+00> : vector<64x8xf32>
    %30 = tpu.matmul %27, %29, %cst_46 {dimension_numbers = #tpu.dot_dimension_numbers<[1], [0], [0], [1], [0, 0, 1, 1], [], []>} : vector<64x72xf32>, vector<72x8xf32>, vector<64x8xf32> -> vector<64x8xf32>
    %c1_47 = arith.constant 1 : index
    %c0_48 = arith.constant 0 : index
    %c0_49 = arith.constant 0 : index
    %31 = vector.load %arg2[%c1_47, %c0_48, %c0_49] : memref<2x72x8xf32, #tpu.memory_space<vmem>>, vector<1x72x8xf32>
    %32 = vector.shape_cast %31 : vector<1x72x8xf32> to vector<72x8xf32>
    %cst_50 = arith.constant dense<0.000000e+00> : vector<64x8xf32>
    %33 = tpu.matmul %27, %32, %cst_50 {dimension_numbers = #tpu.dot_dimension_numbers<[1], [0], [0], [1], [0, 0, 1, 1], [], []>} : vector<64x72xf32>, vector<72x8xf32>, vector<64x8xf32> -> vector<64x8xf32>
    %34 = vector.shape_cast %30 : vector<64x8xf32> to vector<8x8x8xf32>
    %c0_51 = arith.constant 0 : index
    %c0_52 = arith.constant 0 : index
    %c0_53 = arith.constant 0 : index
    %c0_54 = arith.constant 0 : index
    %c0_55 = arith.constant 0 : index
    %35 = vector.load %arg3[%c0_51, %c0_52, %c0_53, %c0_54, %c0_55] : memref<1x8x2x8x8xf32, #tpu.memory_space<vmem>>, vector<1x8x1x8x8xf32>
    %36 = vector.shape_cast %35 : vector<1x8x1x8x8xf32> to vector<8x8x8xf32>
    %37 = vector.shape_cast %34 : vector<8x8x8xf32> to vector<1x8x1x8x8xf32>
    tpu.vector_store %arg3[%c0_51, %c0_52, %c0_53, %c0_54, %c0_55], %37 {strides = array<i32>} : memref<1x8x2x8x8xf32, #tpu.memory_space<vmem>>, vector<1x8x1x8x8xf32>,
    %38 = vector.shape_cast %33 : vector<64x8xf32> to vector<8x8x8xf32>
    %c0_56 = arith.constant 0 : index
    %c0_57 = arith.constant 0 : index
    %c1_58 = arith.constant 1 : index
    %c0_59 = arith.constant 0 : index
    %c0_60 = arith.constant 0 : index
    %39 = vector.load %arg3[%c0_56, %c0_57, %c1_58, %c0_59, %c0_60] : memref<1x8x2x8x8xf32, #tpu.memory_space<vmem>>, vector<1x8x1x8x8xf32>
    %40 = vector.shape_cast %39 : vector<1x8x1x8x8xf32> to vector<8x8x8xf32>
    %41 = vector.shape_cast %38 : vector<8x8x8xf32> to vector<1x8x1x8x8xf32>
    tpu.vector_store %arg3[%c0_56, %c0_57, %c1_58, %c0_59, %c0_60], %41 {strides = array<i32>} : memref<1x8x2x8x8xf32, #tpu.memory_space<vmem>>, vector<1x8x1x8x8xf32>,
    return
  }
  func.func @transform_0(%arg0: i32) -> (i32, i32, i32, i32) {
    %c0_i32 = arith.constant 0 : i32
    %c0_i32_0 = arith.constant 0 : i32
    %c0_i32_1 = arith.constant 0 : i32
    %c0_i32_2 = arith.constant 0 : i32
    return %arg0, %c0_i32, %c0_i32_0, %c0_i32_1 : i32, i32, i32, i32
  }
  func.func @transform_1(%arg0: i32) -> (i32, i32, i32) {
    %c0_i32 = arith.constant 0 : i32
    %c0_i32_0 = arith.constant 0 : i32
    %c0_i32_1 = arith.constant 0 : i32
    %c0_i32_2 = arith.constant 0 : i32
    return %c0_i32, %c0_i32_0, %c0_i32_1 : i32, i32, i32
  }
  func.func @transform_2(%arg0: i32) -> (i32, i32, i32, i32, i32) {
    %c0_i32 = arith.constant 0 : i32
    %c0_i32_0 = arith.constant 0 : i32
    %c0_i32_1 = arith.constant 0 : i32
    %c0_i32_2 = arith.constant 0 : i32
    %c0_i32_3 = arith.constant 0 : i32
    return %arg0, %c0_i32, %c0_i32_0, %c0_i32_1, %c0_i32_2 : i32, i32, i32, i32, i32
  }
}

</mosaic_0001>

<bundles_post_ra>
// kernel: tpu_custom_call.1
= control target key start
LH: loop header
LB: loop body
LE: loop exit
PB: predicated region body
PF: predicated region fallthrough
CT: control target
= control target key end

     0   :  { %7 = vsyncpa [#allocation4], 0  ;;  %s1651_s0 = inlined_call_operand.vmem [shape: f32[2,8,8,8], index: 0, kind: input, shape index: {}]   ;;  %s1652_s1 = inlined_call_operand.vmem [shape: f32[2,72,8], index: 1, kind: input, shape index: {}]   ;;  %s1653_s2 = inlined_call_operand.hbm [shape: f32[2,8,2,8,8], index: 2, kind: output, shape index: {}]  }
   0x1   :  { %9 = vsyncpa [#allocation4 + $0x1], 0  ;;  %s1242_s9 = smov 0   ;;  %s1244_s10 = smov 0  }
   0x2   :  { %s1246_s11 = smov 0   ;;  %s1248_s12 = smov 0  }
   0x3 LB: > { %s1263_s13 = sadd.s32 4294967295, %s1214_s12   ;;  %s930_s14 = sadd.s32 4294967294, %s1214_s12   ;;  %s1214_s12 = sphi %s1248_s12, %s1659_s12   ;;  %s1210_s11 = sphi %s1246_s11, %s1658_s11   ;;  %s1206_s10 = sphi %s1244_s10, %s1657_s10   ;;  %s1202_s9 = sphi %s1242_s9, %s1656_s9  }
   0x4   : > { %s1267_s15 = sadd.s32 1, %s1214_s12   ;;  %s69_s16 = sadd.s32 1, %s1210_s11 }
   0x5   : > { %s66_s17 = ssub.s32 %s1214_s12, %s1267_s15  ;;  %p79_p0 = scmp.ne.s32.totalorder %s1210_s11, %s1206_s10 }
   0x6   : > { %p67_p1 = scmp.eq.s32.totalorder %s66_s17, 0  ;;  %p80_p2 = scmp.eq.s32.totalorder %s1263_s13, 1 }
   0x7   : > { %p85_p3 = scmp.ne.s32.totalorder %s1206_s10, %s1202_s9  ;;  %p86_p4 = scmp.eq.s32.totalorder %s930_s14, 1 }
   0x8   : > { %s1278_s18 = scalar_select %p67_p1, %s1210_s11, %s69_s16  }
   0x9   : > { %p1280_p5 = por %p80_p2, %p79_p0  ;;  %p1284_p6 = por %p86_p4, %p85_p3 }
   0xa   : > { %p933_p7 = scmp.ge.s32.totalorder %s1214_s12, 1  ;;  %p115_p8 = scmp.lt.s32.totalorder %s1214_s12, 3 }
   0xc   : > { %p116_p9 = pnand %p933_p7, %p115_p8 }
   0xd   : > { %vm142_vm0 = vcmask (!%p116_p9), 64512   ;;  %vm144_vm1 = vcmask (!%p116_p9), 58368   ;;  %vm150_vm2 = vcmask (!%p116_p9), 57344   ;;  %v1216_v0 = vmov (!%p116_p9), 0.0   ;;  %p137_p10 = scmp.lt.s32.totalorder (!%p116_p9), %s1263_s13, 1  ;;  %s1217_s26 = smov (!%p116_p9), 16  }
   0xe   : > { %119 = sbr.rel (%p116_p9) target bundleno = 500 (0x1f4), region = 28  ;;  %143 = vst.msk [vmem:[#allocation2] sm:$0xff] (!%p116_p9), %vm142_vm0, %v1216_v0  ;;  %147 = vst.msk [vmem:[#allocation2 + $0x90] sm:$0xff] (!%p116_p9), %vm142_vm0, %v1216_v0  ;;  %s1218_s27 = smov (!%p116_p9), 8   ;;  %v583_v16 = vld [vmem:[%s1652_s1] sm:$0xff] (!%p116_p9)  ;;  %v584_v17 = vld [vmem:[%s1652_s1 + $0x8] sm:$0xff] (!%p116_p9) }
   0xf   : > { %145 = vst.msk [vmem:[#allocation2 + $0x8] sm:$0x3] (!%p116_p9), %vm144_vm1, %v1216_v0  ;;  %148 = vst.msk [vmem:[#allocation2 + $0x98] sm:$0x3] (!%p116_p9), %vm144_vm1, %v1216_v0  ;;  %s1219_s28 = smov (!%p116_p9), 24   ;;  %s1220_s29 = smov (!%p116_p9), 32   ;;  %v1071_v19 = vpack.c.bf16 (!%p116_p9), %v584_v17, %v583_v16 }
  0x10   : > { %159 = vst.msk [vmem:[#allocation2 + $0x19] sm:$0x1] (!%p116_p9), %vm150_vm2, %v1216_v0  ;;  %151 = vst.msk [vmem:[#allocation2 + $0x10] sm:$0x1] (!%p116_p9), %vm150_vm2, %v1216_v0  ;;  %v945_v18 = vld [vmem:[%s1652_s1 + $0x48] sm:$0xff] (!%p116_p9)  ;;  %s1221_s8 = smov (!%p116_p9), 40  }
  0x11   : > { %152 = vst.msk [vmem:[#allocation2 + $0x20] sm:$0x1] (!%p116_p9), %vm150_vm2, %v1216_v0  ;;  %153 = vst.msk [vmem:[#allocation2 + $0x30] sm:$0x1] (!%p116_p9), %vm150_vm2, %v1216_v0  ;;  %v946_v20 = vld [vmem:[%s1652_s1 + $0x50] sm:$0xff] (!%p116_p9)  ;;  %1072 = vmatprep.subr.bf16.mxu0 (!%p116_p9), %v1071_v19  ;;  %v586_v25 = vld [vmem:[%s1652_s1 + $0x18] sm:$0xff] (!%p116_p9) }
  0x12   : > { %154 = vst.msk [vmem:[#allocation2 + $0x40] sm:$0x1] (!%p116_p9), %vm150_vm2, %v1216_v0  ;;  %155 = vst.msk [vmem:[#allocation2 + $0x50] sm:$0x1] (!%p116_p9), %vm150_vm2, %v1216_v0  ;;  %v1087_v23 = vpack.c.bf16 (!%p116_p9), %v946_v20, %v945_v18  ;;  %1074 = vmatpush3.bf16.msra.mxu0 (!%p116_p9), %v1071_v19  ;;  %v585_v24 = vld [vmem:[%s1652_s1 + $0x10] sm:$0xff] (!%p116_p9)  ;;  %v947_v26 = vld [vmem:[%s1652_s1 + $0x58] sm:$0xff] (!%p116_p9) }
  0x13   : > { %156 = vst.msk [vmem:[#allocation2 + $0x60] sm:$0x1] (!%p116_p9), %vm150_vm2, %v1216_v0  ;;  %157 = vst.msk [vmem:[#allocation2 + $0x70] sm:$0x1] (!%p116_p9), %vm150_vm2, %v1216_v0  ;;  %v1075_v27 = vpack.c.bf16 (!%p116_p9), %v586_v25, %v585_v24  ;;  %v948_v28 = vld [vmem:[%s1652_s1 + $0x60] sm:$0xff] (!%p116_p9)  ;;  %v588_v31 = vld [vmem:[%s1652_s1 + $0x28] sm:$0xff] (!%p116_p9) }
  0x14   : > { %158 = vst.msk [vmem:[#allocation2 + $0x80] sm:$0x1] (!%p116_p9), %vm150_vm2, %v1216_v0  ;;  %160 = vst.msk [vmem:[#allocation2 + $0x29] sm:$0x1] (!%p116_p9), %vm150_vm2, %v1216_v0  ;;  %1088 = vmatprep.subr.bf16.mxu1 (!%p116_p9), %v1087_v23  ;;  %v1091_v29 = vpack.c.bf16 (!%p116_p9), %v948_v28, %v947_v26  ;;  %v587_v30 = vld [vmem:[%s1652_s1 + $0x20] sm:$0xff] (!%p116_p9)  ;;  %v949_v32 = vld [vmem:[%s1652_s1 + $0x68] sm:$0xff] (!%p116_p9) }
  0x15   : > { %161 = vst.msk [vmem:[#allocation2 + $0x39] sm:$0x1] %vm150_vm2, %v1216_v0  ;;  %162 = vst.msk [vmem:[#allocation2 + $0x49] sm:$0x1] %vm150_vm2, %v1216_v0  ;;  %s138_s21 = scalar_select %p137_p10, %s1263_s13, 1  ;;  %1090 = vmatpush3.bf16.msra.mxu1 %v1087_v23  ;;  %1076 = vmatprep.subr.bf16.mxu0 %v1075_v27  ;;  %v1079_v33 = vpack.c.bf16 %v588_v31, %v587_v30  ;;  %v950_v34 = vld [vmem:[%s1652_s1 + $0x70] sm:$0xff] }
  0x16   : > { %163 = vst.msk [vmem:[#allocation2 + $0x59] sm:$0x1] %vm150_vm2, %v1216_v0  ;;  %164 = vst.msk [vmem:[#allocation2 + $0x69] sm:$0x1] %vm150_vm2, %v1216_v0  ;;  %v199_v4 = vld [vmem:[#allocation2 + $0x2] sm:$0xff]  ;;  %1092 = vmatprep.subr.bf16.mxu1 %v1091_v29  ;;  %1078 = vmatpush3.bf16.msra.mxu0 %v1075_v27  ;;  %s1222_s17 = smov 48   ;;  %v1095_v37 = vpack.c.bf16 %v950_v34, %v949_v32 }
  0x17   : > { %165 = vst.msk [vmem:[#allocation2 + $0x79] sm:$0x1] %vm150_vm2, %v1216_v0  ;;  %166 = vst.msk [vmem:[#allocation2 + $0x89] sm:$0x1] %vm150_vm2, %v1216_v0  ;;  %s975_s22 = sshll.u32 %s138_s21, 6  ;;  %v191_v5 = vld [vmem:[#allocation2 + $0x1] sm:$0xff]  ;;  %296 = vrot.lane.b32.xlu1 %v199_v4, %s1217_s26  ;;  %1080 = vmatprep.subr.bf16.mxu0 %v1079_v33 }
  0x18   : > { %s141_s25 = scalar_lea.vmem %s1651_s0, %s975_s22  ;;  %264 = vrot.lane.b32.xlu0 %v191_v5, %s1218_s27  ;;  %v589_v38 = vld [vmem:[%s1652_s1 + $0x30] sm:$0xff]  ;;  %v590_v39 = vld [vmem:[%s1652_s1 + $0x38] sm:$0xff]  ;;  %v952_v42 = vld [vmem:[%s1652_s1 + $0x80] sm:$0xff]  ;;  %s1223_s22 = smov 56   ;;  %vm520_vm3 = vcmask 130048   ;;  %vm529_vm4 = vcmask 195584  }
  0x19   : > { %v167_v1 = vld [vmem:[%s141_s25] sm:$0xff]  ;;  %v168_v2 = vld [vmem:[%s141_s25 + $0x8] sm:$0xff]  ;;  %v169_v3 = vld [vmem:[%s141_s25 + $0x10] sm:$0xff]  ;;  %1094 = vmatpush3.bf16.msra.mxu1 %v1091_v29  ;;  %v1083_v41 = vpack.c.bf16 %v590_v39, %v589_v38  ;;  %s1224_s23 = smov 64   ;;  %vm538_vm5 = vcmask 261120   ;;  %vm547_vm6 = vcmask 326656  }
  0x1a   : > { %175 = vst.msk [vmem:[#allocation2 + $0x11] sm:$0xff] %vm142_vm0, %v167_v1  ;;  %176 = vst.msk [vmem:[#allocation2 + $0x21] sm:$0xff] %vm142_vm0, %v168_v2  ;;  %v170_v6 = vld [vmem:[%s141_s25 + $0x18] sm:$0xff]  ;;  %v171_v7 = vld [vmem:[%s141_s25 + $0x20] sm:$0xff]  ;;  %1096 = vmatprep.subr.bf16.mxu1 %v1095_v37  ;;  %1082 = vmatpush3.bf16.msra.mxu0 %v1079_v33  ;;  %vm556_vm7 = vcmask 392192   ;;  %vm565_vm8 = vcmask 457728  }
  0x1b   : > { %177 = vst.msk [vmem:[#allocation2 + $0x31] sm:$0xff] %vm142_vm0, %v169_v3  ;;  %178 = vst.msk [vmem:[#allocation2 + $0x41] sm:$0xff] %vm142_vm0, %v170_v6  ;;  %v172_v8 = vld [vmem:[%s141_s25 + $0x28] sm:$0xff]  ;;  %v173_v9 = vld [vmem:[%s141_s25 + $0x30] sm:$0xff]  ;;  %1084 = vmatprep.subr.bf16.mxu0 %v1083_v41  ;;  %vm574_vm9 = vcmask 523264   ;;  %vm592_vm10 = vcmask 588800  }
  0x1c   : > { %179 = vst.msk [vmem:[#allocation2 + $0x51] sm:$0xff] %vm142_vm0, %v171_v7  ;;  %180 = vst.msk [vmem:[#allocation2 + $0x61] sm:$0xff] %vm142_vm0, %v172_v8  ;;  %v174_v10 = vld [vmem:[%s141_s25 + $0x38] sm:$0xff]  ;;  %v591_v44 = vld [vmem:[%s1652_s1 + $0x40] sm:$0xff]  ;;  %s1225_s4 = smov [#allocation3]  }
  0x1d   : > { %181 = vst.msk [vmem:[#allocation2 + $0x71] sm:$0xff] %vm142_vm0, %v173_v9  ;;  %182 = vst.msk [vmem:[#allocation2 + $0x81] sm:$0xff] %vm142_vm0, %v174_v10  ;;  %v951_v40 = vld [vmem:[%s1652_s1 + $0x78] sm:$0xff]  ;;  %1098 = vmatpush3.bf16.msra.mxu1 %v1095_v37  ;;  %v953_v45 = vld [vmem:[%s1652_s1 + $0x88] sm:$0xff]  ;;  %s1156_s5 = sshll.u32 %s1225_s4, 4  ;;  %s1157_s5 = int_to_ptr.vmem [resolvable:$false] %s1156_s5 }
  0x1e   : > { %v1099_v43 = vpack.c.bf16 %v952_v42, %v951_v40  ;;  %1086 = vmatpush3.bf16.msra.mxu0 %v1083_v41  ;;  %v239_v63 = vld [vmem:[#allocation2 + $0x90] sm:$0xff]  ;;  %v183_v18 = vld [vmem:[#allocation2] sm:$0xff]  ;;  %s1158_s6 = scalar_lea.vmem %s1157_s5, 4096 }
  0x1f   : > { %1027 = vmatprep.subr.mxu0 %v591_v44  ;;  %v247_v0 = vld [vmem:[#allocation2 + $0x91] sm:$0xff] }
  0x20   : > { %1100 = vmatprep.subr.bf16.mxu1 %v1099_v43  ;;  %v255_v3 = vld [vmem:[#allocation2 + $0x92] sm:$0xff] }
  0x21   : > { %v200_v11 = vld [vmem:[#allocation2 + $0x12] sm:$0xff]  ;;  %v1327_v13 = vld [vmem:[#allocation2 + $0x20] sm:$0xff]  ;;  %1102 = vmatpush3.bf16.msra.mxu1 %v1099_v43 }
  0x22   : > { %v192_v12 = vld [vmem:[#allocation2 + $0x11] sm:$0xff]  ;;  %298 = vrot.lane.b32.xlu1 %v200_v11, %s1217_s26  ;;  %v193_v15 = vld [vmem:[#allocation2 + $0x21] sm:$0xff]  ;;  %1057 = vmatprep.subr.mxu1 %v953_v45 }
  0x23   : > { %266 = vrot.lane.b32.xlu0 %v192_v12, %s1218_s27  ;;  %v1329_v14 = vld [vmem:[#allocation2 + $0x10] sm:$0xff]  ;;  %v201_v21 = vld [vmem:[#allocation2 + $0x22] sm:$0xff]  ;;  %1028 = vmatpush3.msra.mxu0 %v591_v44 }
  0x24   : > { %v194_v22 = vld [vmem:[#allocation2 + $0x31] sm:$0xff]  ;;  %v1406_v46 = vld [vmem:[#allocation2 + $0x40] sm:$0xff] }
  0x25   : > { %v1380_v35 = vld [vmem:[#allocation2 + $0x30] sm:$0xff]  ;;  %1058 = vmatpush3.msra.mxu1 %v953_v45  ;;  %v218_v47 = vld [vmem:[#allocation2 + $0x41] sm:$0xff] }
  0x26   : > { %330 = vrot.lane.b32.xlu1 %v1327_v13, %s1219_s28  ;;  %v202_v36 = vld [vmem:[#allocation2 + $0x32] sm:$0xff]  ;;  %v203_v48 = vld [vmem:[#allocation2 + $0x42] sm:$0xff] }
  0x27   : > { %328 = vrot.lane.b32.xlu0 %v1329_v14, %s1219_s28  ;;  %v196_v49 = vld [vmem:[#allocation2 + $0x51] sm:$0xff]  ;;  %v1430_v52 = vld [vmem:[#allocation2 + $0x60] sm:$0xff] }
  0x28   : > { %v1422_v50 = vld [vmem:[#allocation2 + $0x50] sm:$0xff]  ;;  %v220_v53 = vld [vmem:[#allocation2 + $0x61] sm:$0xff] }
  0x29   : > { %v204_v51 = vld [vmem:[#allocation2 + $0x52] sm:$0xff]  ;;  %v205_v54 = vld [vmem:[#allocation2 + $0x62] sm:$0xff] }
  0x2a   : > { %268 = vrot.lane.b32.xlu1 %v193_v15, %s1218_s27  ;;  %v198_v55 = vld [vmem:[#allocation2 + $0x71] sm:$0xff]  ;;  %v214_v58 = vld [vmem:[#allocation2 + $0x80] sm:$0xff] }
  0x2b   : > { %360 = vrot.lane.b32.xlu0 %v192_v12, %s1220_s29  ;;  %v1446_v56 = vld [vmem:[#allocation2 + $0x70] sm:$0xff]  ;;  %v222_v59 = vld [vmem:[#allocation2 + $0x81] sm:$0xff] }
  0x2c   : > { %v206_v57 = vld [vmem:[#allocation2 + $0x72] sm:$0xff]  ;;  %v230_v60 = vld [vmem:[#allocation2 + $0x82] sm:$0xff] }
  0x2e   : > { %392 = vrot.lane.b32.xlu1 %v200_v11, %s1221_s8 }
  0x2f   : > { %362 = vrot.lane.b32.xlu0 %v193_v15, %s1220_s29 }
  0x32   : > { %300 = vrot.lane.b32.xlu1 %v201_v21, %s1217_s26 }
  0x33   : > { %270 = vrot.lane.b32.xlu0 %v194_v22, %s1218_s27 }
  0x36   : > { %424 = vrot.lane.b32.xlu1 %v1327_v13, %s1222_s17 }
  0x37   : > { %394 = vrot.lane.b32.xlu0 %v201_v21, %s1221_s8 }
  0x3a   : > { %332 = vrot.lane.b32.xlu1 %v1380_v35, %s1219_s28 }
  0x3b   : > { %302 = vrot.lane.b32.xlu0 %v202_v36, %s1217_s26 }
  0x3e   : > { %456 = vrot.lane.b32.xlu1 %v193_v15, %s1223_s22 }
  0x3f   : > { %426 = vrot.lane.b32.xlu0 %v1380_v35, %s1222_s17 }
  0x42   : > { %364 = vrot.lane.b32.xlu1 %v194_v22, %s1220_s29 }
  0x43   : > { %334 = vrot.lane.b32.xlu0 %v1406_v46, %s1219_s28 }
  0x46   : > { %488 = vrot.lane.b32.xlu1 %v201_v21, %s1224_s23 }
  0x47   : > { %458 = vrot.lane.b32.xlu0 %v194_v22, %s1223_s22 }
  0x4a   : > { %366 = vrot.lane.b32.xlu1 %v218_v47, %s1220_s29 }
  0x4b   : > { %272 = vrot.lane.b32.xlu0 %v218_v47, %s1218_s27 }
  0x4e   : > { %490 = vrot.lane.b32.xlu1 %v202_v36, %s1224_s23 }
  0x4f   : > { %396 = vrot.lane.b32.xlu0 %v202_v36, %s1221_s8 }
  0x52   : > { %304 = vrot.lane.b32.xlu1 %v203_v48, %s1217_s26 }
  0x53   : > { %274 = vrot.lane.b32.xlu0 %v196_v49, %s1218_s27 }
  0x56   : > { %428 = vrot.lane.b32.xlu1 %v1406_v46, %s1222_s17 }
  0x57   : > { %398 = vrot.lane.b32.xlu0 %v203_v48, %s1221_s8 }
  0x5a   : > { %336 = vrot.lane.b32.xlu1 %v1422_v50, %s1219_s28 }
  0x5b   : > { %306 = vrot.lane.b32.xlu0 %v204_v51, %s1217_s26 }
  0x5e   : > { %460 = vrot.lane.b32.xlu1 %v218_v47, %s1223_s22 }
  0x5f   : > { %430 = vrot.lane.b32.xlu0 %v1422_v50, %s1222_s17 }
  0x62   : > { %368 = vrot.lane.b32.xlu1 %v196_v49, %s1220_s29 }
  0x63   : > { %338 = vrot.lane.b32.xlu0 %v1430_v52, %s1219_s28 }
  0x66   : > { %492 = vrot.lane.b32.xlu1 %v203_v48, %s1224_s23 }
  0x67   : > { %462 = vrot.lane.b32.xlu0 %v196_v49, %s1223_s22 }
  0x6a   : > { %370 = vrot.lane.b32.xlu1 %v220_v53, %s1220_s29 }
  0x6b   : > { %276 = vrot.lane.b32.xlu0 %v220_v53, %s1218_s27 }
  0x6e   : > { %494 = vrot.lane.b32.xlu1 %v204_v51, %s1224_s23 }
  0x6f   : > { %400 = vrot.lane.b32.xlu0 %v204_v51, %s1221_s8 }
  0x72   : > { %308 = vrot.lane.b32.xlu1 %v205_v54, %s1217_s26 }
  0x73   : > { %278 = vrot.lane.b32.xlu0 %v198_v55, %s1218_s27 }
  0x76   : > { %432 = vrot.lane.b32.xlu1 %v1430_v52, %s1222_s17 }
  0x77   : > { %402 = vrot.lane.b32.xlu0 %v205_v54, %s1221_s8 }
  0x7a   : > { %340 = vrot.lane.b32.xlu1 %v1446_v56, %s1219_s28 }
  0x7b   : > { %310 = vrot.lane.b32.xlu0 %v206_v57, %s1217_s26  ;;  %s134_s26 = sand.u32 1, %s1206_s10  }
  0x7e   : > { %464 = vrot.lane.b32.xlu1 %v220_v53, %s1223_s22 }
  0x7f   : > { %434 = vrot.lane.b32.xlu0 %v1446_v56, %s1222_s17 }
  0x82   : > { %372 = vrot.lane.b32.xlu1 %v198_v55, %s1220_s29 }
  0x83   : > { %342 = vrot.lane.b32.xlu0 %v214_v58, %s1219_s28  ;;  %s934_s28 = sshll.u32 %s134_s26, 7 }
  0x86   : > { %496 = vrot.lane.b32.xlu1 %v205_v54, %s1224_s23 }
  0x87   : > { %466 = vrot.lane.b32.xlu0 %v198_v55, %s1223_s22 }
  0x89   : > { %v297_v61 = vpop.permute.xlu1 %296 }
  0x8a   : > { %404 = vrot.lane.b32.xlu1 %v206_v57, %s1221_s8  ;;  %v265_v62 = vpop.permute.xlu0 %264 }
  0x8b   : > { %374 = vrot.lane.b32.xlu0 %v222_v59, %s1220_s29  ;;  %v512_v19 = vsel %vm142_vm0, %v183_v18, %v265_v62  ;;  %s1564_s29 = scalar_lea.vmem [#allocation3], %s934_s28 }
  0x8c   : > { %v521_v22 = vsel %vm520_vm3, %v512_v19, %v297_v61 }
  0x8e   : > { %406 = vrot.lane.b32.xlu1 %v230_v60, %s1221_s8  ;;  %s976_s8 = sshll.u32 %s1263_s13, 11  ;;  %s1609_s13 = scalar_lea.sflag [#allocation4], %s134_s26 }
  0x8f   : > { %498 = vrot.lane.b32.xlu0 %v206_v57, %s1224_s23  ;;  %s1595_s30 = scalar_lea.hbm %s1653_s2, %s976_s8 }
  0x92   : > { %438 = vrot.lane.b32.xlu1 %v239_v63, %s1222_s17 }
  0x93   : > { %436 = vrot.lane.b32.xlu0 %v214_v58, %s1222_s17  ;;  %s868_s17 = sshll.u32 %s1564_s29, 4  ;;  %s1597_s17 = int_to_ptr.vmem [resolvable:$true] %s868_s17 }
  0x94   : > { %v299_v1 = vpop.permute.xlu1 %298  ;;  %s1152_s3 = scalar_lea.vmem %s1597_s17, 2048  ;;  %p1159_p0 = scmp.lt.s32.totalorder %s1597_s17, %s1157_s5 }
  0x95   : > { %v267_v2 = vpop.permute.xlu0 %266  ;;  %p1153_p11 = scmp.ne.s32.totalorder %s1597_s17, %s1152_s3  ;;  %p1160_p1 = scmp.lt.s32.totalorder %s1158_s6, %s1152_s3 }
  0x96   : > { %470 = vrot.lane.b32.xlu1 %v247_v0, %s1223_s22  ;;  %v513_v29 = vsel %vm142_vm0, %v1329_v14, %v267_v2 }
  0x97   : > { %468 = vrot.lane.b32.xlu0 %v222_v59, %s1223_s22  ;;  %v522_v34 = vsel %vm520_vm3, %v513_v29, %v299_v1  ;;  %p1154_p12 = pnand %p1153_p11, %p1280_p5  ;;  %p1161_p2 = por %p1160_p1, %p1159_p0 }
  0x98   : > { %v331_v4 = vpop.permute.xlu1 %330 }
  0x99   : > { %v329_v5 = vpop.permute.xlu0 %328  ;;  %v531_v36 = vsel %vm529_vm4, %v522_v34, %v331_v4  ;;  %p1155_p13 = pneg %p1154_p12 }
  0x9a   : > { %502 = vrot.lane.b32.xlu1 %v255_v3, %s1224_s23  ;;  %v530_v23 = vsel %vm529_vm4, %v521_v22, %v329_v5 }
  0x9b   : > { %500 = vrot.lane.b32.xlu0 %v230_v60, %s1224_s23  ;;  %p1162_p3 = pnand %p1161_p2, %p1155_p13 }
  0x9c   : > { %v269_v6 = vpop.permute.xlu1 %268 }
  0x9d   : > { %v361_v7 = vpop.permute.xlu0 %360  ;;  %v514_v57 = vsel %vm142_vm0, %v1327_v13, %v269_v6 }
  0x9e   : > { %v539_v26 = vsel %vm538_vm5, %v530_v23, %v361_v7 }
  0xa0   : > { %v393_v8 = vpop.permute.xlu1 %392 }
  0xa1   : > { %v363_v9 = vpop.permute.xlu0 %362  ;;  %v548_v27 = vsel %vm547_vm6, %v539_v26, %v393_v8 }
  0xa2   : > { %v540_v39 = vsel %vm538_vm5, %v531_v36, %v363_v9 }
  0xa4   : > { %v301_v10 = vpop.permute.xlu1 %300 }
  0xa5   : > { %v1468_v11 = vpop.permute.xlu0 %270  ;;  %v523_v58 = vsel %vm520_vm3, %v514_v57, %v301_v10 }
  0xa6   : > { %v515_v13 = vsel %vm142_vm0, %v1380_v35, %v1468_v11 }
  0xa8   : > { %v425_v12 = vpop.permute.xlu1 %424 }
  0xa9   : > { %v395_v15 = vpop.permute.xlu0 %394  ;;  %v557_v28 = vsel %vm556_vm7, %v548_v27, %v425_v12 }
  0xaa   : > { %v549_v14 = vsel %vm547_vm6, %v540_v39, %v395_v15 }
  0xac   : > { %v333_v16 = vpop.permute.xlu1 %332 }
  0xad   : > { %v1470_v17 = vpop.permute.xlu0 %302  ;;  %v532_v59 = vsel %vm529_vm4, %v523_v58, %v333_v16 }
  0xae   : > { %v524_v5 = vsel %vm520_vm3, %v515_v13, %v1470_v17 }
  0xb0   : > { %v457_v20 = vpop.permute.xlu1 %456 }
  0xb1   : > { %v427_v21 = vpop.permute.xlu0 %426  ;;  %v566_v30 = vsel %vm565_vm8, %v557_v28, %v457_v20 }
  0xb2   : > { %v558_v40 = vsel %vm556_vm7, %v549_v14, %v427_v21 }
  0xb4   : > { %v365_v24 = vpop.permute.xlu1 %364 }
  0xb5   : > { %v335_v25 = vpop.permute.xlu0 %334  ;;  %v541_v62 = vsel %vm538_vm5, %v532_v59, %v365_v24 }
  0xb6   : > { %v533_v6 = vsel %vm529_vm4, %v524_v5, %v335_v25 }
  0xb8   : > { %v489_v31 = vpop.permute.xlu1 %488 }
  0xb9   : > { %v459_v32 = vpop.permute.xlu0 %458  ;;  %v575_v33 = vsel %vm574_vm9, %v566_v30, %v489_v31 }
  0xba   : > { %1029 = vmatprep.mubr.msk.f32.mxu0 %vm592_vm10, %v575_v33  ;;  %1059 = vmatprep.mubr.msk.f32.mxu1 %vm592_vm10, %v575_v33  ;;  %v567_v41 = vsel %vm565_vm8, %v558_v40, %v459_v32 }
  0xbc   : > { %v367_v37 = vpop.permute.xlu1 %366 }
  0xbd   : > { %v273_v38 = vpop.permute.xlu0 %272  ;;  %v542_v9 = vsel %vm538_vm5, %v533_v6, %v367_v37 }
  0xbe   : > { %v516_v25 = vsel %vm142_vm0, %v1406_v46, %v273_v38 }
  0xc0   : > { %v491_v42 = vpop.permute.xlu1 %490 }
  0xc1   : > { %v397_v43 = vpop.permute.xlu0 %396  ;;  %v576_v44 = vsel %vm574_vm9, %v567_v41, %v491_v42 }
  0xc2   : > { %1030 = vmatmul.mubr.msk.f32.vlgmr.msra.gmra.mrb[0].mxu0 %vm592_vm10, %v576_v44  ;;  %1060 = vmatmul.mubr.msk.f32.vlgmr.msra.gmra.mrb[0].mxu1 %vm592_vm10, %v576_v44  ;;  %v550_v63 = vsel %vm547_vm6, %v541_v62, %v397_v43 }
  0xc4   : > { %v305_v45 = vpop.permute.xlu1 %304 }
  0xc5   : > { %v275_v47 = vpop.permute.xlu0 %274  ;;  %v525_v26 = vsel %vm520_vm3, %v516_v25, %v305_v45 }
  0xc6   : > { %v517_v46 = vsel %vm142_vm0, %v1422_v50, %v275_v47 }
  0xc8   : > { %v429_v48 = vpop.permute.xlu1 %428 }
  0xc9   : > { %v399_v49 = vpop.permute.xlu0 %398  ;;  %v559_v0 = vsel %vm556_vm7, %v550_v63, %v429_v48 }
  0xca   : > { %v551_v10 = vsel %vm547_vm6, %v542_v9, %v399_v49 }
  0xcc   : > { %v337_v51 = vpop.permute.xlu1 %336 }
  0xcd   : > { %v307_v53 = vpop.permute.xlu0 %306  ;;  %v534_v27 = vsel %vm529_vm4, %v525_v26, %v337_v51 }
  0xce   : > { %v526_v38 = vsel %vm520_vm3, %v517_v46, %v307_v53 }
  0xd0   : > { %v461_v54 = vpop.permute.xlu1 %460 }
  0xd1   : > { %v431_v55 = vpop.permute.xlu0 %430  ;;  %v568_v1 = vsel %vm565_vm8, %v559_v0, %v461_v54 }
  0xd2   : > { %v560_v12 = vsel %vm556_vm7, %v551_v10, %v431_v55 }
  0xd4   : > { %v369_v60 = vpop.permute.xlu1 %368 }
  0xd5   : > { %v339_v61 = vpop.permute.xlu0 %338  ;;  %v543_v30 = vsel %vm538_vm5, %v534_v27, %v369_v60 }
  0xd6   : > { %v535_v39 = vsel %vm529_vm4, %v526_v38, %v339_v61 }
  0xd8   : > { %v493_v2 = vpop.permute.xlu1 %492 }
  0xd9   : > { %v463_v3 = vpop.permute.xlu0 %462  ;;  %v577_v4 = vsel %vm574_vm9, %v568_v1, %v493_v2 }
  0xda   : > { %1032 = vmatprep.mubr.msk.f32.mxu0 %vm592_vm10, %v577_v4  ;;  %1062 = vmatprep.mubr.msk.f32.mxu1 %vm592_vm10, %v577_v4  ;;  %v569_v15 = vsel %vm565_vm8, %v560_v12, %v463_v3 }
  0xdc   : > { %v371_v7 = vpop.permute.xlu1 %370 }
  0xdd   : > { %v277_v8 = vpop.permute.xlu0 %276  ;;  %v544_v41 = vsel %vm538_vm5, %v535_v39, %v371_v7 }
  0xde   : > { %v518_v51 = vsel %vm142_vm0, %v1430_v52, %v277_v8 }
  0xe0   : > { %v495_v35 = vpop.permute.xlu1 %494 }
  0xe1   : > { %v401_v11 = vpop.permute.xlu0 %400  ;;  %v578_v16 = vsel %vm574_vm9, %v569_v15, %v495_v35 }
  0xe2   : > { %1033 = vmatmul.mubr.msk.f32.gmra.mrb[2].mxu0 %vm592_vm10, %v578_v16  ;;  %1063 = vmatmul.mubr.msk.f32.gmra.mrb[2].mxu1 %vm592_vm10, %v578_v16  ;;  %v552_v31 = vsel %vm547_vm6, %v543_v30, %v401_v11 }
  0xe4   : > { %v309_v17 = vpop.permute.xlu1 %308 }
  0xe5   : > { %v279_v18 = vpop.permute.xlu0 %278  ;;  %v527_v54 = vsel %vm520_vm3, %v518_v51, %v309_v17 }
  0xe6   : > { %v519_v53 = vsel %vm142_vm0, %v1446_v56, %v279_v18 }
  0xe8   : > { %v433_v19 = vpop.permute.xlu1 %432 }
  0xe9   : > { %v403_v20 = vpop.permute.xlu0 %402  ;;  %v561_v32 = vsel %vm556_vm7, %v552_v31, %v433_v19 }
  0xea   : > { %v553_v42 = vsel %vm547_vm6, %v544_v41, %v403_v20 }
  0xec   : > { %v341_v21 = vpop.permute.xlu1 %340 }
  0xed   : > { %v311_v22 = vpop.permute.xlu0 %310  ;;  %v536_v57 = vsel %vm529_vm4, %v527_v54, %v341_v21 }
  0xee   : > { %v528_v55 = vsel %vm520_vm3, %v519_v53, %v311_v22 }
  0xf0   : > { %v465_v23 = vpop.permute.xlu1 %464 }
  0xf1   : > { %v435_v24 = vpop.permute.xlu0 %434  ;;  %v570_v33 = vsel %vm565_vm8, %v561_v32, %v465_v23 }
  0xf2   : > { %v562_v43 = vsel %vm556_vm7, %v553_v42, %v435_v24 }
  0xf4   : > { %v373_v28 = vpop.permute.xlu1 %372 }
  0xf5   : > { %v343_v29 = vpop.permute.xlu0 %342  ;;  %v545_v61 = vsel %vm538_vm5, %v536_v57, %v373_v28 }
  0xf6   : > { %v537_v58 = vsel %vm529_vm4, %v528_v55, %v343_v29 }
  0xf8   : > { %v497_v34 = vpop.permute.xlu1 %496 }
  0xf9   : > { %v467_v36 = vpop.permute.xlu0 %466  ;;  %v579_v37 = vsel %vm574_vm9, %v570_v33, %v497_v34 }
  0xfa   : > { %1035 = vmatprep.mubr.msk.f32.mxu0 %vm592_vm10, %v579_v37  ;;  %1065 = vmatprep.mubr.msk.f32.mxu1 %vm592_vm10, %v579_v37  ;;  %v571_v44 = vsel %vm565_vm8, %v562_v43, %v467_v36 }
  0xfc   : > { %v405_v14 = vpop.permute.xlu1 %404 }
  0xfd   : > { %v375_v40 = vpop.permute.xlu0 %374  ;;  %v554_v52 = vsel %vm547_vm6, %v545_v61, %v405_v14 }
  0xfe   : > { %v546_v62 = vsel %vm538_vm5, %v537_v58, %v375_v40 }
 0x100   : > { %v407_v45 = vpop.permute.xlu1 %406 }
 0x101   : > { %v499_v50 = vpop.permute.xlu0 %498  ;;  %v555_v56 = vsel %vm547_vm6, %v546_v62, %v407_v45 }
 0x102   : > { %v580_v47 = vsel %vm574_vm9, %v571_v44, %v499_v50 }
 0x103   : > { %1036 = vmatmul.mubr.msk.f32.gmra.mrb[4].mxu0 %vm592_vm10, %v580_v47  ;;  %1066 = vmatmul.mubr.msk.f32.gmra.mrb[4].mxu1 %vm592_vm10, %v580_v47 }
 0x104   : > { %v439_v48 = vpop.permute.xlu1 %438 }
 0x105   : > { %v437_v49 = vpop.permute.xlu0 %436  ;;  %v564_v63 = vsel %vm556_vm7, %v555_v56, %v439_v48 }
 0x106   : > { %v563_v0 = vsel %vm556_vm7, %v554_v52, %v437_v49 }
 0x108   : > { %v471_v59 = vpop.permute.xlu1 %470 }
 0x109   : > { %v469_v60 = vpop.permute.xlu0 %468  ;;  %v573_v1 = vsel %vm565_vm8, %v564_v63, %v471_v59 }
 0x10a   : > { %v572_v2 = vsel %vm565_vm8, %v563_v0, %v469_v60 }
 0x10c   : > { %v503_v3 = vpop.permute.xlu1 %502 }
 0x10d   : > { %v501_v4 = vpop.permute.xlu0 %500  ;;  %v582_v13 = vsel %vm574_vm9, %v573_v1, %v503_v3 }
 0x10e   : > { %v581_v5 = vsel %vm574_vm9, %v572_v2, %v501_v4 }
 0x10f   : > { %1038 = vmatprep.mubr.msk.f32.mxu0 %vm592_vm10, %v581_v5  ;;  %1068 = vmatprep.mubr.msk.f32.mxu1 %vm592_vm10, %v581_v5 }
 0x110   : > { %1039 = vmatmul.mubr.msk.f32.gmra.mrb[6].mxu0 %vm592_vm10, %v582_v13  ;;  %1069 = vmatmul.mubr.msk.f32.gmra.mrb[6].mxu1 %vm592_vm10, %v582_v13 }
 0x195   : > { %v1031_v6 = vpop.f32.mrb[0].mxu0  ;;  %v1061_v7 = vpop.f32.mrb[0].mxu1 }
 0x196   : > { %838 = vst.msk [vmem:[%s1564_s29 + $0x10] sm:$0xff] %vm142_vm0, %v1031_v6  ;;  %963 = vst.msk [vmem:[%s1564_s29 + $0x18] sm:$0xff] %vm142_vm0, %v1061_v7  ;;  %v683_v8 = vpop.f32.mrb[1].mxu0  ;;  %v798_v9 = vpop.f32.mrb[1].mxu1 }
 0x197   : > { %837 = vst.msk [vmem:[%s1564_s29] sm:$0xff] %vm142_vm0, %v683_v8  ;;  %962 = vst.msk [vmem:[%s1564_s29 + $0x8] sm:$0xff] %vm142_vm0, %v798_v9 }
 0x1b5   : > { %v1034_v10 = vpop.f32.mrb[2].mxu0  ;;  %v1064_v12 = vpop.f32.mrb[2].mxu1 }
 0x1b6   : > { %840 = vst.msk [vmem:[%s1564_s29 + $0x30] sm:$0xff] %vm142_vm0, %v1034_v10  ;;  %965 = vst.msk [vmem:[%s1564_s29 + $0x38] sm:$0xff] %vm142_vm0, %v1064_v12  ;;  %v693_v15 = vpop.f32.mrb[3].mxu0  ;;  %v808_v35 = vpop.f32.mrb[3].mxu1 }
 0x1b7   : > { %839 = vst.msk [vmem:[%s1564_s29 + $0x20] sm:$0xff] %vm142_vm0, %v693_v15  ;;  %964 = vst.msk [vmem:[%s1564_s29 + $0x28] sm:$0xff] %vm142_vm0, %v808_v35 }
 0x1d6   : > { %v1037_v11 = vpop.f32.mrb[4].mxu0  ;;  %v1067_v16 = vpop.f32.mrb[4].mxu1 }
 0x1d7   : > { %842 = vst.msk [vmem:[%s1564_s29 + $0x50] sm:$0xff] %vm142_vm0, %v1037_v11  ;;  %967 = vst.msk [vmem:[%s1564_s29 + $0x58] sm:$0xff] %vm142_vm0, %v1067_v16  ;;  %v703_v17 = vpop.f32.mrb[5].mxu0  ;;  %v818_v18 = vpop.f32.mrb[5].mxu1 }
 0x1d8   : > { %841 = vst.msk [vmem:[%s1564_s29 + $0x40] sm:$0xff] %vm142_vm0, %v703_v17  ;;  %966 = vst.msk [vmem:[%s1564_s29 + $0x48] sm:$0xff] %vm142_vm0, %v818_v18 }
 0x1e3   : > { %v1040_v19 = vpop.f32.mrb[6].mxu0  ;;  %v1070_v20 = vpop.f32.mrb[6].mxu1 }
 0x1e4   : > { %844 = vst.msk [vmem:[%s1564_s29 + $0x70] sm:$0xff] %vm142_vm0, %v1040_v19  ;;  %969 = vst.msk [vmem:[%s1564_s29 + $0x78] sm:$0xff] %vm142_vm0, %v1070_v20  ;;  %v713_v21 = vpop.f32.mrb[7].mxu0  ;;  %v828_v22 = vpop.f32.mrb[7].mxu1 }
 0x1e5   : > { %843 = vst.msk [vmem:[%s1564_s29 + $0x60] sm:$0xff] %vm142_vm0, %v713_v21  ;;  %968 = vst.msk [vmem:[%s1564_s29 + $0x68] sm:$0xff] %vm142_vm0, %v828_v22 }
 0x1e6   : > { %1165 = shalt.err (!%p1162_p3)
}
 0x1e7   : > { %s1166_s7 = scalar_lea.hbm %s1595_s30, 2048  ;;  %s1170_s21 = scalar_lea.hbm %s1653_s2, 4096 }
 0x1e8   : > { %p1167_p4 = scmp.ne.s32.totalorder %s1595_s30, %s1166_s7  ;;  %p1171_p9 = scmp.lt.u32.totalorder %s1595_s30, %s1653_s2 }
 0x1e9   : > { %p1172_p10 = scmp.lt.u32.totalorder %s1170_s21, %s1166_s7  ;;  %p1174_p12 = scmp.lt.u32.totalorder %s1166_s7, %s1595_s30 }
 0x1ea   : > { %p1168_p7 = pnand %p1167_p4, %p1280_p5 }
 0x1eb   : > { %p1173_p11 = por %p1172_p10, %p1171_p9 }
 0x1ec   : > { %p1169_p8 = pneg %p1168_p7 }
 0x1ed   : > { %p1175_p13 = por %p1174_p12, %p1173_p11 }
 0x1ef   : > { %p1176_p0 = pnand %p1175_p13, %p1169_p8 }
 0x1f1   : > { %1179 = shalt.err (!%p1176_p0)
}
 0x1f2   : > { %s1226_s26 = smov 128  }
 0x1f3   : > { %1103 = dma.vmem_to_hbm [thread:$0]  (%p1280_p5), %s1597_s17, 2048, %s1595_s30, %s1609_s13, %s1226_s26, %s1226_s26, %s1218_s27  }
 0x1f4 PF: > { %p1109_p1 = scmp.ge.s32.totalorder %s1214_s12, 2  ;;  %s883_s28 = sand.u32 1, %s1202_s9  }
 0x1f5   : > { %s884_s29 = scalar_lea.sflag [#allocation4], %s883_s28 }
 0x1f6   : > { %p1106_p2 = pnand %p1109_p1, %p1284_p6 }
 0x1f8   : > { %1197 = dma.done.wait (!%p1106_p2), %s884_s29, 2048  }
 0x1f9   : > { %1199 = vsyncadd (!%p1106_p2), %s884_s29, 4294965248  ;;  %p12_p3 = scmp.ge.s32.totalorder %s1267_s15, 4   ;;  %s1656_s9 = smov %s1206_s10 }
 0x1fa   : > { %s1657_s10 = smov %s1210_s11  ;;  %s1658_s11 = smov %s1278_s18 }
 0x1fb   : > { %s1659_s12 = smov %s1267_s15  ;;  %14 = sbr.rel (!%p12_p3) target bundleno = 3 (0x3), region = 68 }
 0x202   :  { %889 = vsyncpa [#allocation4], 1 }
 0x203   :  { %891 = vsyncpa [#allocation4 + $0x1], 1 }

</bundles_post_ra>
